<compile_context>
chip_gen: v7x
topology: tpu7x:2x2x1
jax: 0.10.0
libtpu: 0.0.40
codegen_flags: <defaults>
</compile_context>

<pallas_src>
import functools

import jax
import jax.numpy as jnp
from jax.experimental import pallas as pl
from jax.experimental.pallas import tpu as pltpu

LANES = 128
SUBLANES = 8
DEFAULT_BLOCK_ROWS = 8192   # (8192, 128) f32 = 4 MiB per input block


@functools.lru_cache(maxsize=None)
def _tensorcores_per_chip():
    """2 shards only on chips with two TensorCores per device (v7x)."""
    try:
        kind = getattr(jax.devices()[0], "device_kind", "").lower()
    except Exception:
        return 1
    return 2 if "v7" in kind else 1


@functools.lru_cache(maxsize=None)
def _vmem_capacity_bytes():
    try:
        return int(pltpu.get_tpu_info().vmem_capacity_bytes)
    except Exception:
        return 64 * 1024 * 1024   # conservative (v7x-sized) fallback


def _focal_terms(pred, gt):
    """Per-element loss contribution and positive indicator (both f32).

    relu(1 - gt)^4 == (1 - gt)^4 * [gt < 1] for every gt, so the reference's
    separate neg mask (compare + cast + mul) is not needed.  pos / neg terms
    are mutually exclusive -> a single log per element; the quartic is two
    VPU multiplies, never lax.pow.
    """
    is_pos = gt == 1.0
    omp = 1.0 - pred
    omg = jnp.maximum(1.0 - gt, 0.0)
    omg2 = omg * omg
    neg_w = omg2 * omg2
    log_arg = jnp.where(is_pos, pred, omp)
    weight = jnp.where(is_pos, omp * omp, pred * pred * neg_w)
    return jnp.log(log_arg) * weight, is_pos.astype(jnp.float32)


def _accumulate(loss_acc, pos_acc, contrib, pos_f, block_rows):
    """Reduce a (block_rows, 128) block to one (8, 128) vreg and accumulate."""
    shape3 = (block_rows // SUBLANES, SUBLANES, LANES)
    loss_acc[...] += contrib.reshape(shape3).sum(axis=0)
    pos_acc[...] += pos_f.reshape(shape3).sum(axis=0)


def _focal_kernel(pred_ref, gt_ref, out_ref, loss_acc, pos_acc, *,
                  block_rows, blocks_per_shard, n_blocks, valid_rows,
                  mask_threshold):
    """Accumulates sum(pos_loss + neg_loss) and sum(pos_inds) for one shard."""
    c = pl.program_id(0)          # shard index ("parallel" axis)
    i = pl.program_id(1)          # block within the shard ("arbitrary" axis)

    @pl.when(i == 0)
    def _init():
        loss_acc[...] = jnp.zeros_like(loss_acc)
        pos_acc[...] = jnp.zeros_like(pos_acc)

    pred = pred_ref[...].astype(jnp.float32)
    gt = gt_ref[...].astype(jnp.float32)

    if mask_threshold is None:
        # Grid tiles the rows exactly: no masking anywhere.
        contrib, pos_f = _focal_terms(pred, gt)
        _accumulate(loss_acc, pos_acc, contrib, pos_f, block_rows)
    else:
        blk = c * blocks_per_shard + i
        needs_mask = blk >= mask_threshold

        @pl.when(jnp.logical_not(needs_mask))
        def _fast():
            contrib, pos_f = _focal_terms(pred, gt)
            _accumulate(loss_acc, pos_acc, contrib, pos_f, block_rows)

        @pl.when(needs_mask)
        def _masked():
            # Ragged last block (rows past `valid_rows` hold garbage from the
            # boundary DMA) and/or a clamped duplicate block (blk >= n_blocks)
            # must contribute exactly zero.  Use select (not multiply) so
            # garbage NaN/inf never propagates into the sums.
            contrib, pos_f = _focal_terms(pred, gt)
            row0 = jnp.minimum(blk, n_blocks - 1) * block_rows
            row_id = jax.lax.broadcasted_iota(
                jnp.int32, (block_rows, LANES), 0) + row0
            valid = (row_id < valid_rows) & (blk < n_blocks)
            contrib = jnp.where(valid, contrib, 0.0)
            pos_f = jnp.where(valid, pos_f, 0.0)
            _accumulate(loss_acc, pos_acc, contrib, pos_f, block_rows)

    @pl.when(i == pl.num_programs(1) - 1)
    def _finalize():
        out_ref[0, 0] = jnp.sum(loss_acc[...])
        out_ref[0, 1] = jnp.sum(pos_acc[...])


def _focal_sums_pallas(pred2d, gt2d, max_block_rows, num_shards):
    """Returns (sum of pos+neg loss terms, number of positives) for a
    lane-dense (rows, 128) slab with rows a multiple of 8."""
    rows = pred2d.shape[0]
    itemsize = max(jnp.dtype(pred2d.dtype).itemsize,
                   jnp.dtype(gt2d.dtype).itemsize)

    # Tile sizing: as large as requested, capped so that 2 inputs x 2
    # pipeline buffers stay inside ~1/3 of physical VMEM (v7x has only
    # 64 MiB physical / 32 MiB default scoped, half of v5e/v6e).
    max_block_rows = max(SUBLANES, (max_block_rows // SUBLANES) * SUBLANES)
    vmem_budget = _vmem_capacity_bytes() // 3
    cap_rows = vmem_budget // (4 * LANES * itemsize)
    cap_rows = max(SUBLANES, (cap_rows // SUBLANES) * SUBLANES)
    block_rows = min(rows, max_block_rows, cap_rows)

    n_blocks = pl.cdiv(rows, block_rows)
    num_shards = num_shards if n_blocks >= num_shards else 1
    blocks_per_shard = pl.cdiv(n_blocks, num_shards)

    last_ragged = (rows % block_rows) != 0
    need_clamp = (num_shards * blocks_per_shard) != n_blocks
    if last_ragged:
        mask_threshold = n_blocks - 1     # ragged last block + any duplicates
    elif need_clamp:
        mask_threshold = n_blocks         # only the clamped duplicate block(s)
    else:
        mask_threshold = None             # no masking path emitted at all

    if need_clamp:
        def in_index_map(c, i):
            return (jnp.minimum(c * blocks_per_shard + i, n_blocks - 1), 0)
    else:
        def in_index_map(c, i):
            return (c * blocks_per_shard + i, 0)

    kernel = functools.partial(
        _focal_kernel,
        block_rows=block_rows,
        blocks_per_shard=blocks_per_shard,
        n_blocks=n_blocks,
        valid_rows=rows,
        mask_threshold=mask_threshold,
    )

    n_elems = rows * LANES
    cost = pl.CostEstimate(
        flops=15 * n_elems,
        transcendentals=n_elems,
        bytes_accessed=2 * n_elems * itemsize,
    )

    # Raise the scoped-VMEM limit enough for the double-buffered input tiles
    # (matters on v5e's 16 MiB default), but never above physical capacity.
    block_bytes = block_rows * LANES * itemsize
    vmem_limit = int(min(_vmem_capacity_bytes(),
                         max(16 * 1024 * 1024, 4 * block_bytes + (16 << 20))))

    in_spec = pl.BlockSpec((block_rows, LANES), in_index_map)
    out = pl.pallas_call(
        kernel,
        out_shape=jax.ShapeDtypeStruct((num_shards, 2), jnp.float32),
        grid_spec=pltpu.PrefetchScalarGridSpec(
            num_scalar_prefetch=0,
            grid=(num_shards, blocks_per_shard),
            in_specs=[in_spec, in_spec],
            out_specs=pl.BlockSpec((1, 2), lambda c, i: (c, 0),
                                   memory_space=pltpu.SMEM),
            scratch_shapes=[
                pltpu.VMEM((SUBLANES, LANES), jnp.float32),
                pltpu.VMEM((SUBLANES, LANES), jnp.float32),
            ],
        ),
        # On v7x, if xprof shows a single busy TensorCore, switch the leading
        # axis to pltpu.CORE_PARALLEL to force the megacore split.
        compiler_params=pltpu.CompilerParams(
            dimension_semantics=("parallel", "arbitrary"),
            vmem_limit_bytes=vmem_limit),
        cost_estimate=cost,
    )(pred2d, gt2d)

    return jnp.sum(out[:, 0]), jnp.sum(out[:, 1])


@functools.partial(jax.jit, static_argnums=(2, 3))
def _focal_loss_impl(pred, gt, max_block_rows, num_shards):
    assert pred.shape == gt.shape
    pred_flat = pred.reshape(-1)
    gt_flat = gt.reshape(-1)
    total = pred_flat.shape[0]

    # Kernel consumes whole (8, 128) vreg tiles; the < 1024-element ragged
    # tail is handled in plain JAX below (no concatenate/pad copy of the
    # full tensors in HBM).
    rows = (total // (SUBLANES * LANES)) * SUBLANES
    main = rows * LANES

    loss_sum = jnp.float32(0.0)
    num_pos = jnp.float32(0.0)

    if rows > 0:
        pred2d = pred_flat[:main].reshape(rows, LANES)
        gt2d = gt_flat[:main].reshape(rows, LANES)
        blk_loss, blk_pos = _focal_sums_pallas(
            pred2d, gt2d, max_block_rows, num_shards)
        loss_sum = loss_sum + blk_loss
        num_pos = num_pos + blk_pos

    if total > main:
        pred_t = pred_flat[main:].astype(jnp.float32)
        gt_t = gt_flat[main:].astype(jnp.float32)
        contrib, pos_f = _focal_terms(pred_t, gt_t)
        loss_sum = loss_sum + jnp.sum(contrib)
        num_pos = num_pos + jnp.sum(pos_f)

    # When num_pos == 0 the positive term is identically zero, so -(pos+neg)
    # == -neg and a single guarded divide reproduces both branches of the
    # PyTorch module.
    return -loss_sum / jnp.where(num_pos == 0, 1.0, num_pos)


def focal_loss(pred, gt, *, max_block_rows=DEFAULT_BLOCK_ROWS, num_shards=None):
    """Equivalent of FocalLoss.forward(pred, gt) from models/losses.py."""
    if num_shards is None:
        num_shards = _tensorcores_per_chip()
    return _focal_loss_impl(pred, gt, int(max_block_rows), int(num_shards))


def _focal_loss_ref(pred, gt):
    """Pure-JAX reference mirroring the PyTorch module."""
    pred = pred.astype(jnp.float32)
    gt = gt.astype(jnp.float32)
    pos_inds = (gt == 1.0).astype(jnp.float32)
    neg_inds = (gt < 1.0).astype(jnp.float32)
    neg_weights = jnp.power(1.0 - gt, 4)
    pos_loss = jnp.log(pred) * jnp.power(1.0 - pred, 2) * pos_inds
    neg_loss = jnp.log(1.0 - pred) * jnp.power(pred, 2) * neg_weights * neg_inds
    num_pos = pos_inds.sum()
    pos_loss = pos_loss.sum()
    neg_loss = neg_loss.sum()
    return jnp.where(
        num_pos == 0,
        -neg_loss,
        -(pos_loss + neg_loss) / jnp.where(num_pos == 0, 1.0, num_pos),
    )


def _make_inputs(key, shape, peak_frac=0.98):
    k_pred, k_gt, k_peak = jax.random.split(key, 3)
    # pred: probabilities strictly in (0, 1)
    pred = jax.nn.sigmoid(jax.random.normal(k_pred, shape, jnp.float32))
    pred = jnp.clip(pred, 1e-4, 1.0 - 1e-4)
    # gt: gaussian-ish heatmap in [0, 1] with some exact-1 peak locations
    gt = jax.random.uniform(k_gt, shape, jnp.float32) * 0.9
    peaks = jax.random.uniform(k_peak, shape) > peak_frac
    gt = jnp.where(peaks, 1.0, gt)
    return pred, gt


if __name__ == "__main__":
    key = jax.random.PRNGKey(0)
    k1, k2, k3, k4 = jax.random.split(key, 4)

    # 1) Canonical small NCHW shape: single full-extent block, fast path.
    pred, gt = _make_inputs(k1, (2, 4, 16, 16))
    out = jax.block_until_ready(focal_loss(pred, gt))
    ref = _focal_loss_ref(pred, gt)
    assert jnp.allclose(out, ref, rtol=5e-4, atol=1e-4), (out, ref)

    # 2) Multi-block with a forced 2-way shard split and an odd block count:
    #    exercises the clamped-duplicate-block masked path.
    pred2, gt2 = _make_inputs(k2, (2, 16, 96, 96))
    ref2 = _focal_loss_ref(pred2, gt2)
    out2 = jax.block_until_ready(
        focal_loss(pred2, gt2, max_block_rows=256, num_shards=2))
    assert jnp.allclose(out2, ref2, rtol=5e-4, atol=1e-4), (out2, ref2)

    # 3) Ragged last block (rows % block_rows != 0): masked path.
    out3 = jax.block_until_ready(
        focal_loss(pred2, gt2, max_block_rows=320, num_shards=2))
    assert jnp.allclose(out3, ref2, rtol=5e-4, atol=1e-4), (out3, ref2)

    # 4) Element count not a multiple of 1024: plain-JAX ragged-tail path.
    pred4, gt4 = _make_inputs(k3, (2, 4, 15, 15))
    out4 = jax.block_until_ready(focal_loss(pred4, gt4))
    ref4 = _focal_loss_ref(pred4, gt4)
    assert jnp.allclose(out4, ref4, rtol=5e-4, atol=1e-4), (out4, ref4)

    # 5) No positive locations: num_pos == 0 branch.
    pred5, gt5 = _make_inputs(k4, (2, 4, 16, 16), peak_frac=2.0)
    out5 = jax.block_until_ready(focal_loss(pred5, gt5))
    ref5 = _focal_loss_ref(pred5, gt5)
    assert jnp.allclose(out5, ref5, rtol=5e-4, atol=1e-4), (out5, ref5)

    # 6) Default auto-tuned path (chip-dependent shards / tile size).
    out6 = jax.block_until_ready(focal_loss(pred2, gt2))
    assert jnp.allclose(out6, ref2, rtol=5e-4, atol=1e-4), (out6, ref2)

    print("KERNEL_OK")
</pallas_src>

<mosaic_0001>
module attributes {stable_mosaic.version = 11 : i64} {
  func.func @_focal_kernel(%arg0: i32, %arg1: i32, %arg2: memref<16x128xf32, #tpu.memory_space<vmem>>, %arg3: memref<16x128xf32, #tpu.memory_space<vmem>>, %arg4: memref<1x2xf32, #tpu.memory_space<smem>>, %arg5: memref<8x128xf32, #tpu.memory_space<vmem>>, %arg6: memref<8x128xf32, #tpu.memory_space<vmem>>) attributes {dimension_semantics = [#tpu.dimension_semantics<parallel>, #tpu.dimension_semantics<arbitrary>], iteration_bounds = array<i64: 1, 1>, scalar_prefetch = 0 : i64, scratch_operands = 2 : i64, tpu.core_type = #tpu.core_type<tc>, window_params = [{transform_indices = @transform_0, window_bounds = array<i64: 16, 128>}, {transform_indices = @transform_1, window_bounds = array<i64: 16, 128>}, {transform_indices = @transform_2, window_bounds = array<i64: 1, 2>}]} {
    %c0_i32 = arith.constant 0 : i32
    %0 = arith.cmpi eq, %arg1, %c0_i32 : i32
    %1 = arith.extui %0 : i1 to i32
    %c0_i32_0 = arith.constant 0 : i32
    %2 = arith.cmpi ne, %1, %c0_i32_0 : i32
    scf.if %2 {
      %cst_19 = arith.constant 0.000000e+00 : f32
      %37 = vector.broadcast %cst_19 : f32 to vector<8x128xf32>
      %c0_20 = arith.constant 0 : index
      %c0_21 = arith.constant 0 : index
      %38 = vector.load %arg5[%c0_20, %c0_21] : memref<8x128xf32, #tpu.memory_space<vmem>>, vector<8x128xf32>
      tpu.vector_store %arg5[%c0_20, %c0_21], %37 {strides = array<i32>} : memref<8x128xf32, #tpu.memory_space<vmem>>, vector<8x128xf32>,
      %cst_22 = arith.constant 0.000000e+00 : f32
      %39 = vector.broadcast %cst_22 : f32 to vector<8x128xf32>
      %c0_23 = arith.constant 0 : index
      %c0_24 = arith.constant 0 : index
      %40 = vector.load %arg6[%c0_23, %c0_24] : memref<8x128xf32, #tpu.memory_space<vmem>>, vector<8x128xf32>
      tpu.vector_store %arg6[%c0_23, %c0_24], %39 {strides = array<i32>} : memref<8x128xf32, #tpu.memory_space<vmem>>, vector<8x128xf32>,
    } else {
    }
    %c0 = arith.constant 0 : index
    %c0_1 = arith.constant 0 : index
    %3 = vector.load %arg2[%c0, %c0_1] : memref<16x128xf32, #tpu.memory_space<vmem>>, vector<16x128xf32>
    %c0_2 = arith.constant 0 : index
    %c0_3 = arith.constant 0 : index
    %4 = vector.load %arg3[%c0_2, %c0_3] : memref<16x128xf32, #tpu.memory_space<vmem>>, vector<16x128xf32>
    %cst = arith.constant 1.000000e+00 : f32
    %5 = vector.broadcast %cst : f32 to vector<16x128xf32>
    %6 = arith.cmpf oeq, %4, %5 : vector<16x128xf32>
    %cst_4 = arith.constant 1.000000e+00 : f32
    %7 = vector.broadcast %cst_4 : f32 to vector<16x128xf32>
    %8 = arith.subf %7, %3 : vector<16x128xf32>
    %cst_5 = arith.constant 1.000000e+00 : f32
    %9 = vector.broadcast %cst_5 : f32 to vector<16x128xf32>
    %10 = arith.subf %9, %4 : vector<16x128xf32>
    %cst_6 = arith.constant 0.000000e+00 : f32
    %11 = vector.broadcast %cst_6 : f32 to vector<16x128xf32>
    %12 = arith.maximumf %10, %11 : vector<16x128xf32>
    %13 = arith.mulf %12, %12 : vector<16x128xf32>
    %14 = arith.mulf %13, %13 : vector<16x128xf32>
    %15 = arith.select %6, %3, %8 : vector<16x128xi1>, vector<16x128xf32>
    %16 = arith.mulf %8, %8 : vector<16x128xf32>
    %17 = arith.mulf %3, %3 : vector<16x128xf32>
    %18 = arith.mulf %17, %14 : vector<16x128xf32>
    %19 = arith.select %6, %16, %18 : vector<16x128xi1>, vector<16x128xf32>
    %20 = math.log %15 : vector<16x128xf32>
    %21 = arith.mulf %20, %19 : vector<16x128xf32>
    %22 = arith.extui %6 : vector<16x128xi1> to vector<16x128xi32>
    %23 = arith.sitofp %22 : vector<16x128xi32> to vector<16x128xf32>
    %c0_7 = arith.constant 0 : index
    %c0_8 = arith.constant 0 : index
    %24 = vector.load %arg5[%c0_7, %c0_8] : memref<8x128xf32, #tpu.memory_space<vmem>>, vector<8x128xf32>
    %25 = vector.shape_cast %21 : vector<16x128xf32> to vector<2x8x128xf32>
    %cst_9 = arith.constant dense<0.000000e+00> : vector<8x128xf32>
    %26 = vector.multi_reduction <add>, %25, %cst_9 [0] : vector<2x8x128xf32> to vector<8x128xf32>
    %27 = arith.addf %24, %26 : vector<8x128xf32>
    %c0_10 = arith.constant 0 : index
    %c0_11 = arith.constant 0 : index
    %28 = vector.load %arg5[%c0_10, %c0_11] : memref<8x128xf32, #tpu.memory_space<vmem>>, vector<8x128xf32>
    tpu.vector_store %arg5[%c0_10, %c0_11], %27 {strides = array<i32>} : memref<8x128xf32, #tpu.memory_space<vmem>>, vector<8x128xf32>,
    %c0_12 = arith.constant 0 : index
    %c0_13 = arith.constant 0 : index
    %29 = vector.load %arg6[%c0_12, %c0_13] : memref<8x128xf32, #tpu.memory_space<vmem>>, vector<8x128xf32>
    %30 = vector.shape_cast %23 : vector<16x128xf32> to vector<2x8x128xf32>
    %cst_14 = arith.constant dense<0.000000e+00> : vector<8x128xf32>
    %31 = vector.multi_reduction <add>, %30, %cst_14 [0] : vector<2x8x128xf32> to vector<8x128xf32>
    %32 = arith.addf %29, %31 : vector<8x128xf32>
    %c0_15 = arith.constant 0 : index
    %c0_16 = arith.constant 0 : index
    %33 = vector.load %arg6[%c0_15, %c0_16] : memref<8x128xf32, #tpu.memory_space<vmem>>, vector<8x128xf32>
    tpu.vector_store %arg6[%c0_15, %c0_16], %32 {strides = array<i32>} : memref<8x128xf32, #tpu.memory_space<vmem>>, vector<8x128xf32>,
    %c0_i32_17 = arith.constant 0 : i32
    %34 = arith.cmpi eq, %arg1, %c0_i32_17 : i32
    %35 = arith.extui %34 : i1 to i32
    %c0_i32_18 = arith.constant 0 : i32
    %36 = arith.cmpi ne, %35, %c0_i32_18 : i32
    scf.if %36 {
      %c0_19 = arith.constant 0 : index
      %c0_20 = arith.constant 0 : index
      %37 = vector.load %arg5[%c0_19, %c0_20] : memref<8x128xf32, #tpu.memory_space<vmem>>, vector<8x128xf32>
      %38 = vector.shape_cast %37 : vector<8x128xf32> to vector<1x8x128xf32>
      %cst_21 = arith.constant dense<0.000000e+00> : vector<1xf32>
      %39 = vector.multi_reduction <add>, %38, %cst_21 [1, 2] : vector<1x8x128xf32> to vector<1xf32>
      %40 = vector.shape_cast %39 : vector<1xf32> to vector<1x1x1xf32>
      %41 = vector.extract %40[0, 0, 0] : f32 from vector<1x1x1xf32>
      %c0_22 = arith.constant 0 : index
      %c0_23 = arith.constant 0 : index
      %42 = memref.load %arg4[%c0_22, %c0_23] : memref<1x2xf32, #tpu.memory_space<smem>>
      memref.store %41, %arg4[%c0_22, %c0_23] : memref<1x2xf32, #tpu.memory_space<smem>>
      %c0_24 = arith.constant 0 : index
      %c0_25 = arith.constant 0 : index
      %43 = vector.load %arg6[%c0_24, %c0_25] : memref<8x128xf32, #tpu.memory_space<vmem>>, vector<8x128xf32>
      %44 = vector.shape_cast %43 : vector<8x128xf32> to vector<1x8x128xf32>
      %cst_26 = arith.constant dense<0.000000e+00> : vector<1xf32>
      %45 = vector.multi_reduction <add>, %44, %cst_26 [1, 2] : vector<1x8x128xf32> to vector<1xf32>
      %46 = vector.shape_cast %45 : vector<1xf32> to vector<1x1x1xf32>
      %47 = vector.extract %46[0, 0, 0] : f32 from vector<1x1x1xf32>
      %c0_27 = arith.constant 0 : index
      %c1 = arith.constant 1 : index
      %48 = memref.load %arg4[%c0_27, %c1] : memref<1x2xf32, #tpu.memory_space<smem>>
      memref.store %47, %arg4[%c0_27, %c1] : memref<1x2xf32, #tpu.memory_space<smem>>
    } else {
    }
    return
  }
  func.func @transform_0(%arg0: i32, %arg1: i32) -> (i32, i32) {
    %c1_i32 = arith.constant 1 : i32
    %0 = arith.muli %arg0, %c1_i32 : i32
    %1 = arith.addi %0, %arg1 : i32
    %c0_i32 = arith.constant 0 : i32
    %c0_i32_0 = arith.constant 0 : i32
    return %1, %c0_i32 : i32, i32
  }
  func.func @transform_1(%arg0: i32, %arg1: i32) -> (i32, i32) {
    %c1_i32 = arith.constant 1 : i32
    %0 = arith.muli %arg0, %c1_i32 : i32
    %1 = arith.addi %0, %arg1 : i32
    %c0_i32 = arith.constant 0 : i32
    %c0_i32_0 = arith.constant 0 : i32
    return %1, %c0_i32 : i32, i32
  }
  func.func @transform_2(%arg0: i32, %arg1: i32) -> (i32, i32) {
    %c0_i32 = arith.constant 0 : i32
    %c0_i32_0 = arith.constant 0 : i32
    return %arg0, %c0_i32 : i32, i32
  }
}

</mosaic_0001>

<bundles_post_ra>
// kernel: _focal_loss_impl.1
= control target key start
LH: loop header
LB: loop body
LE: loop exit
PB: predicated region body
PF: predicated region fallthrough
CT: control target
= control target key end

     0   :  { %s224_s0 = inlined_call_operand.vmem [shape: f32[16,128], index: 0, kind: input, shape index: {}]   ;;  %s225_s1 = inlined_call_operand.vmem [shape: f32[16,128], index: 1, kind: input, shape index: {}]   ;;  %s226_s2 = inlined_call_operand.vmem [shape: f32[1,2], index: 2, kind: output, shape index: {}]  }
   0x1   :  { %v62_v0 = vld [vmem:[%s224_s0] sm:$0xff]  ;;  %v63_v1 = vld [vmem:[%s224_s0 + $0x8] sm:$0xff] }
   0x2   :  { %v64_v2 = vld [vmem:[%s225_s1] sm:$0xff]  ;;  %v65_v3 = vld [vmem:[%s225_s1 + $0x8] sm:$0xff]  ;;  %v68_v4 = vsub.f32 1.0, %v62_v0  ;;  %v69_v5 = vsub.f32 1.0, %v63_v1 }
   0x3   :  { %vm66_vm0 = vcmp.eq.f32.partialorder %v64_v2, 1.0  ;;  %v70_v6 = vsub.f32 1.0, %v64_v2  ;;  %vm67_vm1 = vcmp.eq.f32.partialorder %v65_v3, 1.0  ;;  %v71_v7 = vsub.f32 1.0, %v65_v3 }
   0x4   :  { %7 = vsyncpa [#allocation5], 0  ;;  %v78_v9 = vsel %vm66_vm0, %v62_v0, %v68_v4  ;;  %v79_v10 = vsel %vm67_vm1, %v63_v1, %v69_v5  ;;  %v82_v14 = vmul.f32 %v62_v0, %v62_v0  ;;  %v83_v16 = vmul.f32 %v63_v1, %v63_v1  ;;  %s139_s18 = sshll.u32 %s226_s2, 4  ;;  %s140_s18 = int_to_ptr.vmem [resolvable:$true] %s139_s18 }
   0x5   :  { %v72_v8 = vmax.f32 %v70_v6, 0.0  ;;  %v73_v11 = vmax.f32 %v71_v7, 0.0  ;;  %168 = vlog2.f32 %v78_v9  ;;  %v80_v18 = vmul.f32 %v68_v4, %v68_v4  ;;  %s172_s20 = scalar_lea.vmem %s140_s18, 16  ;;  %p177_p1 = scmp.lt.s32.totalorder %s140_s18, %s140_s18 }
   0x6   :  { %170 = vlog2.f32 %v79_v10  ;;  %v81_v20 = vmul.f32 %v69_v5, %v69_v5  ;;  %v186_v30 = vmov 0.0   ;;  %p173_p0 = scmp.ne.s32.totalorder %s140_s18, %s172_s20  ;;  %p178_p2 = scmp.lt.s32.totalorder %s172_s20, %s172_s20 }
   0x7   :  { %v74_v12 = vmul.f32 %v72_v8, %v72_v8  ;;  %v75_v13 = vmul.f32 %v73_v11, %v73_v11  ;;  %v160_v31 = vsel %vm66_vm0, 1.0, %v186_v30  ;;  %v161_v32 = vsel %vm67_vm1, 1.0, %v186_v30 }
   0x8   :  { %v103_v34 = vadd.f32 %v161_v32, %v160_v31  ;;  %p179_p3 = por %p178_p2, %p177_p1 }
   0x9   :  { %v76_v15 = vmul.f32 %v74_v12, %v74_v12  ;;  %v77_v17 = vmul.f32 %v75_v13, %v75_v13 }
   0xa   :  { %p180_p4 = pnand %p179_p3, %p173_p0 }
   0xb   :  { %v84_v19 = vmul.f32 %v82_v14, %v76_v15  ;;  %v85_v21 = vmul.f32 %v83_v16, %v77_v17 }
   0xd   :  { %v86_v23 = vsel %vm66_vm0, %v80_v18, %v84_v19  ;;  %v87_v25 = vsel %vm67_vm1, %v81_v20, %v85_v21 }
   0xf   :  { %v169_v22 = vpop.eup %168 }
  0x10   :  { %v171_v24 = vpop.eup %170  ;;  %v89_v26 = vmul.f32 0.6931472, %v169_v22 }
  0x11   :  { %v91_v27 = vmul.f32 0.6931472, %v171_v24 }
  0x12   :  { %v92_v28 = vmul.f32 %v89_v26, %v86_v23 }
  0x13   :  { %v93_v29 = vmul.f32 %v91_v27, %v87_v25 }
  0x15   :  { %v99_v33 = vadd.f32 %v93_v29, %v92_v28 }
  0x17   :  { %110 = vadd.xlane.f32.xlu0 %v99_v33 }
  0x1b   :  { %122 = vadd.xlane.f32.xlu0 %v103_v34 }
  0xa4   :  { %v111_v35 = vpop.xlane.xlu0 %110 }
  0xa5   :  { %v112_v36 = vrot.slane %v111_v35, 4 }
  0xa7   :  { %v113_v37 = vadd.f32 %v112_v36, %v111_v35 }
  0xa8   :  { %v123_v38 = vpop.xlane.xlu0 %122 }
  0xa9   :  { %v114_v39 = vrot.slane %v113_v37, 2  ;;  %v124_v40 = vrot.slane %v123_v38, 4 }
  0xab   :  { %v125_v41 = vadd.f32 %v124_v40, %v123_v38  ;;  %v115_v42 = vadd.f32 %v114_v39, %v113_v37 }
  0xad   :  { %v126_v43 = vrot.slane %v125_v41, 2  ;;  %v116_v44 = vrot.slane %v115_v42, 1 }
  0xaf   :  { %v127_v45 = vadd.f32 %v126_v43, %v125_v41  ;;  %v117_v46 = vadd.f32 %v116_v44, %v115_v42 }
  0xb1   :  { %162 = vpush %v117_v46  ;;  %v128_v47 = vrot.slane %v127_v45, 1 }
  0xb3   :  { %v129_v48 = vadd.f32 %v128_v47, %v127_v45 }
  0xb5   :  { %164 = vpush %v129_v48 }
  0xe2   :  { %s163_s0 = spop %162 }
  0xe3   :  { %120 = sst [smem:[#allocation4]] %s163_s0 }
  0xe6   :  { %s165_s19 = spop %164 }
  0xe7   :  { %132 = sst [smem:[#allocation4 + $0x1]] %s165_s19 }
  0xe8   :  { %183 = shalt.err (!%p180_p4)
}
  0xe9   :  { %s187_s21 = smov [#allocation4]  }
  0xea   :  { %142 = dma.smem_to_vmem %s187_s21, 16, %s140_s18, [#allocation5]  }
  0xeb   :  { %184 = dma.done.wait [#allocation5], 16  }
  0xec   :  { %185 = vsyncadd [#allocation5], 4294967280 }
  0xed   :  { %146 = sfence }
  0xee   :  { %147 = vsyncpa [#allocation5], 1 }

</bundles_post_ra>
